<compile_context>
chip_gen: v7x
topology: tpu7x:2x2x1
jax: 0.10.0
libtpu: 0.0.40
codegen_flags: <defaults>
</compile_context>

<pallas_src>
import jax
import jax.numpy as jnp
from jax import lax
from jax.experimental import pallas as pl
from jax.experimental.pallas import tpu as pltpu

KSIZE = 4
STRIDE = 2
PAD = 1
BN_EPS = 1e-5
LEAKY_SLOPE = 0.2
MASK_INIT = 0.25

LANE = 128
SUBLANE = 8
TILE_P_MAX = 2048                 # max P-tile width (multiple of 128)
VMEM_TILE_BUDGET = 24 << 20       # pipeline-buffer budget -> fits v7x's 64 MiB VMEM
VMEM_LIMIT_BYTES = 40 << 20       # explicit scoped-VMEM limit (defaults: 16/32/32 MiB)


def _round_up(x, m):
    return (x + m - 1) // m * m


def _pick_tile_p(k_img, k_msk, coutp):
    """Largest lane-aligned P-tile whose double-buffered pipeline footprint
    stays under VMEM_TILE_BUDGET (worst of pass 1 / pass 2)."""
    per_col_p1 = 4 * (k_img + k_msk) + 8 * coutp   # 2x bf16 patch bufs + 2x two bf16 out bufs
    per_col_p2 = 12 * coutp                        # 2x bf16 in + 2x f32 out
    per_col = max(per_col_p1, per_col_p2)
    weight_bytes = 4 * coutp * (k_img + k_msk)     # bf16 weights, default-double-buffered
    budget = max(VMEM_TILE_BUDGET - weight_bytes, LANE * per_col)
    cap = (budget // per_col) // LANE * LANE
    return int(min(max(cap, LANE), TILE_P_MAX))


def _im2col_kmajor(x_nchw, howo_pad, out_dtype):
    """[N, C, H, W] -> [N, C*K*K, howo_pad] patches (zero-padded columns).

    Row order (c, ki, kj) matches PyTorch weight.reshape(Cout, -1) columns;
    column order within an image is (ho, wo) with wo fastest."""
    n, c, h, w = x_nchw.shape
    xp = jnp.pad(x_nchw, ((0, 0), (0, 0), (PAD, PAD), (PAD, PAD)))
    ho = (h + 2 * PAD - KSIZE) // STRIDE + 1
    wo = (w + 2 * PAD - KSIZE) // STRIDE + 1
    taps = []
    for ki in range(KSIZE):
        for kj in range(KSIZE):
            taps.append(xp[:, :, ki:ki + STRIDE * ho:STRIDE,
                           kj:kj + STRIDE * wo:STRIDE])          # [N, C, Ho, Wo]
    cols = jnp.stack(taps, axis=2)                               # [N, C, K*K, Ho, Wo]
    cols = cols.reshape(n, c * KSIZE * KSIZE, ho * wo).astype(out_dtype)
    if howo_pad > ho * wo:
        cols = jnp.pad(cols, ((0, 0), (0, 0), (0, howo_pad - ho * wo)))
    return cols


def _pconv_stats_kernel(pimg_ref, pmsk_ref, wimg_ref, wmsk_ref,
                        forcat_ref, maskact_ref, sum_ref, ssq_ref):
    """Pass 1: conv + maskConv MXU matmuls, tanh/abs/mul, per-tile BN partials."""
    conv_feat = jnp.dot(wimg_ref[...], pimg_ref[...],
                        preferred_element_type=jnp.float32)      # [coutp, tp] f32
    mask_feat = jnp.dot(wmsk_ref[...], pmsk_ref[...],
                        preferred_element_type=jnp.float32)
    mask_act = jnp.abs(jnp.tanh(mask_feat))                      # EUP tanh, f32
    conv_out = conv_feat * mask_act

    forcat_ref[...] = conv_out.astype(forcat_ref.dtype)
    maskact_ref[...] = mask_act.astype(maskact_ref.dtype)

    # Per-(image, tile) BatchNorm partials, written exactly once per grid step
    # so both grid axes stay "parallel" (v7x megacore); reduced in plain JAX.
    # Zero-padded columns contribute 0 to both sums; the wrapper divides by
    # the true element count.
    sum_ref[...] = jnp.sum(conv_out, axis=1, keepdims=True)
    ssq_ref[...] = jnp.sum(conv_out * conv_out, axis=1, keepdims=True)


def _bn_leaky_kernel(x_ref, scale_ref, shift_ref, o_ref):
    """Pass 2: y = x * scale + shift (folded BatchNorm), then LeakyReLU(0.2)."""
    y = x_ref[...].astype(jnp.float32) * scale_ref[...] + shift_ref[...]
    o_ref[...] = jnp.where(y > 0, y, LEAKY_SLOPE * y)


def adaptive_pconv_define(input_features, input_masks, w_conv, w_mask,
                          concat_dtype=jnp.bfloat16):
    """input_features: [N, Cin, H, W], input_masks: [N, Cm, H, W] (NCHW).
    w_conv: [Cout, Cin, 4, 4], w_mask: [Cout, Cm, 4, 4].
    Returns (forConcat, features, maskActiv) in NCHW.  forConcat / maskActiv
    are stored & returned in `concat_dtype` (bf16 by default, per perf
    review); `features` is f32."""
    n, cin, h, w = input_features.shape
    cout = w_conv.shape[0]
    cm = w_mask.shape[1]
    coutp = _round_up(cout, SUBLANE)

    ho = (h + 2 * PAD - KSIZE) // STRIDE + 1
    wo = (w + 2 * PAD - KSIZE) // STRIDE + 1
    howo = ho * wo
    k_img = cin * KSIZE * KSIZE        # multiples of 16 -> sublane aligned, no K padding
    k_msk = cm * KSIZE * KSIZE

    # P tiling: VMEM-budgeted tile width; last-tile padding bounded by <128 cols.
    howo_128 = _round_up(howo, LANE)
    tp_cap = _pick_tile_p(k_img, k_msk, coutp)
    num_tiles = pl.cdiv(howo_128, tp_cap)
    tp = _round_up(pl.cdiv(howo_128, num_tiles), LANE)
    howo_pad = tp * num_tiles

    # im2col glue in plain JAX (K-major per image so the kernel sees lane-dense
    # P tiles); single materialization pass, no separate concat/pad pass.
    # TODO(synk): pull patch extraction into the kernel (manual DMA of
    # overlapping row strips) to avoid materializing the ~4x-expanded patch
    # buffers in HBM at all.
    pimg = _im2col_kmajor(input_features, howo_pad, jnp.bfloat16)   # [N, k_img, howo_pad]
    pmsk = _im2col_kmajor(input_masks, howo_pad, jnp.bfloat16)      # [N, k_msk, howo_pad]

    # Weights as [coutp, K] bf16. Rows cout..coutp are zero; their conv output
    # and BN stats are exact zeros (mean=0, var=0 -> scale ~ 1/sqrt(eps)), and
    # they are sliced away below — keep it that way if the layout changes.
    w_img = jnp.pad(w_conv.reshape(cout, k_img),
                    ((0, coutp - cout), (0, 0))).astype(jnp.bfloat16)
    w_msk = jnp.pad(w_mask.reshape(cout, k_msk),
                    ((0, coutp - cout), (0, 0))).astype(jnp.bfloat16)

    def tile_spec(ch):
        return pl.BlockSpec((None, ch, tp), lambda i, j: (i, 0, j))

    def full_spec(shape):
        return pl.BlockSpec(shape, lambda i, j: (0,) * len(shape))

    stat_spec = pl.BlockSpec((None, None, coutp, 1), lambda i, j: (i, j, 0, 0))

    forcat_t, maskact_t, psum, pssq = pl.pallas_call(
        _pconv_stats_kernel,
        out_shape=(
            jax.ShapeDtypeStruct((n, coutp, howo_pad), concat_dtype),     # forConcat
            jax.ShapeDtypeStruct((n, coutp, howo_pad), concat_dtype),     # maskActiv
            jax.ShapeDtypeStruct((n, num_tiles, coutp, 1), jnp.float32),  # partial sum
            jax.ShapeDtypeStruct((n, num_tiles, coutp, 1), jnp.float32),  # partial sum x^2
        ),
        grid=(n, num_tiles),
        in_specs=[
            tile_spec(k_img),            # image patches (auto double-buffered)
            tile_spec(k_msk),            # mask patches
            full_spec((coutp, k_img)),   # conv weight: VMEM-resident (constant index_map)
            full_spec((coutp, k_msk)),   # mask-conv weight
        ],
        out_specs=(tile_spec(coutp), tile_spec(coutp), stat_spec, stat_spec),
        compiler_params=pltpu.CompilerParams(
            dimension_semantics=("parallel", "parallel"),
            vmem_limit_bytes=VMEM_LIMIT_BYTES),
    )(pimg, pmsk, w_img, w_msk)

    # Global BatchNorm2d batch stats (training mode, biased variance, gamma=1,
    # beta=0), folded into per-channel scale/shift.  Tiny arrays, plain JAX.
    # NOTE: var = E[x^2] - mean^2 in one f32 sweep; acceptable here because the
    # conv outputs are near zero-mean (0.02-std weights); clamped at 0.
    count = jnp.float32(n * howo)
    csum = jnp.sum(psum, axis=(0, 1))        # [coutp, 1]
    cssq = jnp.sum(pssq, axis=(0, 1))
    mean = csum / count
    var = jnp.maximum(cssq / count - mean * mean, 0.0)
    inv_std = lax.rsqrt(var + BN_EPS)
    scale = inv_std
    shift = -mean * inv_std

    features_t = pl.pallas_call(
        _bn_leaky_kernel,
        out_shape=jax.ShapeDtypeStruct((n, coutp, howo_pad), jnp.float32),
        grid=(n, num_tiles),
        in_specs=[tile_spec(coutp), full_spec((coutp, 1)), full_spec((coutp, 1))],
        out_specs=tile_spec(coutp),
        compiler_params=pltpu.CompilerParams(
            dimension_semantics=("parallel", "parallel"),
            vmem_limit_bytes=VMEM_LIMIT_BYTES),
    )(forcat_t, scale, shift)

    # NCHW packaging: slice away channel/column padding + reshape.  No
    # transpose; a pure view when cout % 8 == 0 and ho*wo % 128 == 0.
    def to_nchw(x_t):
        return x_t[:, :cout, :howo].reshape(n, cout, ho, wo)

    return to_nchw(forcat_t), to_nchw(features_t), to_nchw(maskact_t)


if __name__ == "__main__":
    key = jax.random.PRNGKey(0)
    k1, k2, k3 = jax.random.split(key, 3)

    N, Cin, H, W = 2, 4, 16, 16
    Cout = 8
    Cmask = 3 if Cin == 4 else Cin   # LearningPartialConv: 3 mask channels when inC == 4

    x = jax.random.normal(k1, (N, Cin, H, W), dtype=jnp.float32)
    mask = jax.random.uniform(k2, (N, Cmask, H, W), dtype=jnp.float32)

    # Deterministic parameter init mirroring the module's __init__:
    w_conv = 0.02 * jax.random.normal(k3, (Cout, Cin, KSIZE, KSIZE), dtype=jnp.float32)
    w_mask = jnp.full((Cout, Cmask, KSIZE, KSIZE), MASK_INIT, dtype=jnp.float32)

    fn = jax.jit(adaptive_pconv_define)
    for_concat, features, mask_activ = fn(x, mask, w_conv, w_mask)
    jax.block_until_ready((for_concat, features, mask_activ))

    assert for_concat.shape == (N, Cout, H // 2, W // 2)
    assert features.shape == (N, Cout, H // 2, W // 2)
    assert mask_activ.shape == (N, Cout, H // 2, W // 2)
    assert bool(jnp.all(jnp.isfinite(for_concat.astype(jnp.float32))))
    assert bool(jnp.all(jnp.isfinite(features)))
    assert bool(jnp.all(jnp.isfinite(mask_activ.astype(jnp.float32))))

    # Plain-JAX/XLA reference (f32 convs + training-mode BN + LeakyReLU).
    conv_ref = lax.conv_general_dilated(x, w_conv, (STRIDE, STRIDE),
                                        ((PAD, PAD), (PAD, PAD)),
                                        dimension_numbers=("NCHW", "OIHW", "NCHW"))
    mskf_ref = lax.conv_general_dilated(mask, w_mask, (STRIDE, STRIDE),
                                        ((PAD, PAD), (PAD, PAD)),
                                        dimension_numbers=("NCHW", "OIHW", "NCHW"))
    mact_ref = jnp.abs(jnp.tanh(mskf_ref))
    fc_ref = conv_ref * mact_ref
    mu = fc_ref.mean(axis=(0, 2, 3), keepdims=True)
    vr = fc_ref.var(axis=(0, 2, 3), keepdims=True)
    feat_ref = (fc_ref - mu) * lax.rsqrt(vr + BN_EPS)
    feat_ref = jnp.where(feat_ref > 0, feat_ref, LEAKY_SLOPE * feat_ref)

    # Tolerances account for the deliberate bf16 patch/weight/output storage.
    assert bool(jnp.allclose(for_concat.astype(jnp.float32), fc_ref, atol=5e-2, rtol=5e-2))
    assert bool(jnp.allclose(mask_activ.astype(jnp.float32), mact_ref, atol=2e-2, rtol=2e-2))
    assert bool(jnp.allclose(features, feat_ref, atol=1.2e-1, rtol=5e-2))

    print("KERNEL_OK")
</pallas_src>

<mosaic_0001>
module attributes {stable_mosaic.version = 11 : i64} {
  func.func @_pconv_stats_kernel(%arg0: i32, %arg1: i32, %arg2: memref<1x64x128xbf16, #tpu.memory_space<vmem>>, %arg3: memref<1x48x128xbf16, #tpu.memory_space<vmem>>, %arg4: memref<8x64xbf16, #tpu.memory_space<vmem>>, %arg5: memref<8x48xbf16, #tpu.memory_space<vmem>>, %arg6: memref<1x8x128xbf16, #tpu.memory_space<vmem>>, %arg7: memref<1x8x128xbf16, #tpu.memory_space<vmem>>, %arg8: memref<1x1x8x1xf32, #tpu.memory_space<vmem>>, %arg9: memref<1x1x8x1xf32, #tpu.memory_space<vmem>>) attributes {dimension_semantics = [#tpu.dimension_semantics<parallel>, #tpu.dimension_semantics<parallel>], iteration_bounds = array<i64: 2, 1>, scalar_prefetch = 0 : i64, scratch_operands = 0 : i64, tpu.core_type = #tpu.core_type<tc>, window_params = [{transform_indices = @transform_0, window_bounds = array<i64: 1, 64, 128>}, {transform_indices = @transform_1, window_bounds = array<i64: 1, 48, 128>}, {pipeline_mode = #tpu.pipeline_mode<synchronous>, transform_indices = @transform_2, window_bounds = array<i64: 8, 64>}, {pipeline_mode = #tpu.pipeline_mode<synchronous>, transform_indices = @transform_3, window_bounds = array<i64: 8, 48>}, {transform_indices = @transform_4, window_bounds = array<i64: 1, 8, 128>}, {transform_indices = @transform_5, window_bounds = array<i64: 1, 8, 128>}, {transform_indices = @transform_6, window_bounds = array<i64: 1, 1, 8, 1>}, {transform_indices = @transform_7, window_bounds = array<i64: 1, 1, 8, 1>}]} {
    %c0 = arith.constant 0 : index
    %c0_0 = arith.constant 0 : index
    %0 = vector.load %arg4[%c0, %c0_0] : memref<8x64xbf16, #tpu.memory_space<vmem>>, vector<8x64xbf16>
    %c0_1 = arith.constant 0 : index
    %c0_2 = arith.constant 0 : index
    %c0_3 = arith.constant 0 : index
    %1 = vector.load %arg2[%c0_1, %c0_2, %c0_3] : memref<1x64x128xbf16, #tpu.memory_space<vmem>>, vector<1x64x128xbf16>
    %2 = vector.shape_cast %1 : vector<1x64x128xbf16> to vector<64x128xbf16>
    %cst = arith.constant dense<0.000000e+00> : vector<8x128xf32>
    %3 = tpu.matmul %0, %2, %cst {dimension_numbers = #tpu.dot_dimension_numbers<[1], [0], [0], [1], [0, 0, 1, 1], [], []>} : vector<8x64xbf16>, vector<64x128xbf16>, vector<8x128xf32> -> vector<8x128xf32>
    %c0_4 = arith.constant 0 : index
    %c0_5 = arith.constant 0 : index
    %4 = vector.load %arg5[%c0_4, %c0_5] : memref<8x48xbf16, #tpu.memory_space<vmem>>, vector<8x48xbf16>
    %c0_6 = arith.constant 0 : index
    %c0_7 = arith.constant 0 : index
    %c0_8 = arith.constant 0 : index
    %5 = vector.load %arg3[%c0_6, %c0_7, %c0_8] : memref<1x48x128xbf16, #tpu.memory_space<vmem>>, vector<1x48x128xbf16>
    %6 = vector.shape_cast %5 : vector<1x48x128xbf16> to vector<48x128xbf16>
    %cst_9 = arith.constant dense<0.000000e+00> : vector<8x128xf32>
    %7 = tpu.matmul %4, %6, %cst_9 {dimension_numbers = #tpu.dot_dimension_numbers<[1], [0], [0], [1], [0, 0, 1, 1], [], []>} : vector<8x48xbf16>, vector<48x128xbf16>, vector<8x128xf32> -> vector<8x128xf32>
    %8 = math.tanh %7 : vector<8x128xf32>
    %9 = math.absf %8 : vector<8x128xf32>
    %10 = arith.mulf %3, %9 : vector<8x128xf32>
    %11 = arith.truncf %10 : vector<8x128xf32> to vector<8x128xbf16>
    %c0_10 = arith.constant 0 : index
    %c0_11 = arith.constant 0 : index
    %c0_12 = arith.constant 0 : index
    %12 = vector.load %arg6[%c0_10, %c0_11, %c0_12] : memref<1x8x128xbf16, #tpu.memory_space<vmem>>, vector<1x8x128xbf16>
    %13 = vector.shape_cast %12 : vector<1x8x128xbf16> to vector<8x128xbf16>
    %14 = vector.shape_cast %11 : vector<8x128xbf16> to vector<1x8x128xbf16>
    tpu.vector_store %arg6[%c0_10, %c0_11, %c0_12], %14 {strides = array<i32>} : memref<1x8x128xbf16, #tpu.memory_space<vmem>>, vector<1x8x128xbf16>,
    %15 = arith.truncf %9 : vector<8x128xf32> to vector<8x128xbf16>
    %c0_13 = arith.constant 0 : index
    %c0_14 = arith.constant 0 : index
    %c0_15 = arith.constant 0 : index
    %16 = vector.load %arg7[%c0_13, %c0_14, %c0_15] : memref<1x8x128xbf16, #tpu.memory_space<vmem>>, vector<1x8x128xbf16>
    %17 = vector.shape_cast %16 : vector<1x8x128xbf16> to vector<8x128xbf16>
    %18 = vector.shape_cast %15 : vector<8x128xbf16> to vector<1x8x128xbf16>
    tpu.vector_store %arg7[%c0_13, %c0_14, %c0_15], %18 {strides = array<i32>} : memref<1x8x128xbf16, #tpu.memory_space<vmem>>, vector<1x8x128xbf16>,
    %cst_16 = arith.constant dense<0.000000e+00> : vector<8xf32>
    %19 = vector.multi_reduction <add>, %10, %cst_16 [1] : vector<8x128xf32> to vector<8xf32>
    %20 = vector.shape_cast %19 : vector<8xf32> to vector<8x1xf32>
    %c0_17 = arith.constant 0 : index
    %c0_18 = arith.constant 0 : index
    %c0_19 = arith.constant 0 : index
    %c0_20 = arith.constant 0 : index
    %21 = vector.load %arg8[%c0_17, %c0_18, %c0_19, %c0_20] : memref<1x1x8x1xf32, #tpu.memory_space<vmem>>, vector<1x1x8x1xf32>
    %22 = vector.shape_cast %21 : vector<1x1x8x1xf32> to vector<8x1xf32>
    %23 = vector.shape_cast %20 : vector<8x1xf32> to vector<1x1x8x1xf32>
    tpu.vector_store %arg8[%c0_17, %c0_18, %c0_19, %c0_20], %23 {strides = array<i32>} : memref<1x1x8x1xf32, #tpu.memory_space<vmem>>, vector<1x1x8x1xf32>,
    %24 = arith.mulf %10, %10 : vector<8x128xf32>
    %cst_21 = arith.constant dense<0.000000e+00> : vector<8xf32>
    %25 = vector.multi_reduction <add>, %24, %cst_21 [1] : vector<8x128xf32> to vector<8xf32>
    %26 = vector.shape_cast %25 : vector<8xf32> to vector<8x1xf32>
    %c0_22 = arith.constant 0 : index
    %c0_23 = arith.constant 0 : index
    %c0_24 = arith.constant 0 : index
    %c0_25 = arith.constant 0 : index
    %27 = vector.load %arg9[%c0_22, %c0_23, %c0_24, %c0_25] : memref<1x1x8x1xf32, #tpu.memory_space<vmem>>, vector<1x1x8x1xf32>
    %28 = vector.shape_cast %27 : vector<1x1x8x1xf32> to vector<8x1xf32>
    %29 = vector.shape_cast %26 : vector<8x1xf32> to vector<1x1x8x1xf32>
    tpu.vector_store %arg9[%c0_22, %c0_23, %c0_24, %c0_25], %29 {strides = array<i32>} : memref<1x1x8x1xf32, #tpu.memory_space<vmem>>, vector<1x1x8x1xf32>,
    return
  }
  func.func @transform_0(%arg0: i32, %arg1: i32) -> (i32, i32, i32) {
    %c0_i32 = arith.constant 0 : i32
    %c0_i32_0 = arith.constant 0 : i32
    return %arg0, %c0_i32, %arg1 : i32, i32, i32
  }
  func.func @transform_1(%arg0: i32, %arg1: i32) -> (i32, i32, i32) {
    %c0_i32 = arith.constant 0 : i32
    %c0_i32_0 = arith.constant 0 : i32
    return %arg0, %c0_i32, %arg1 : i32, i32, i32
  }
  func.func @transform_2(%arg0: i32, %arg1: i32) -> (i32, i32) {
    %c0_i32 = arith.constant 0 : i32
    %c0_i32_0 = arith.constant 0 : i32
    %c0_i32_1 = arith.constant 0 : i32
    return %c0_i32, %c0_i32_0 : i32, i32
  }
  func.func @transform_3(%arg0: i32, %arg1: i32) -> (i32, i32) {
    %c0_i32 = arith.constant 0 : i32
    %c0_i32_0 = arith.constant 0 : i32
    %c0_i32_1 = arith.constant 0 : i32
    return %c0_i32, %c0_i32_0 : i32, i32
  }
  func.func @transform_4(%arg0: i32, %arg1: i32) -> (i32, i32, i32) {
    %c0_i32 = arith.constant 0 : i32
    %c0_i32_0 = arith.constant 0 : i32
    return %arg0, %c0_i32, %arg1 : i32, i32, i32
  }
  func.func @transform_5(%arg0: i32, %arg1: i32) -> (i32, i32, i32) {
    %c0_i32 = arith.constant 0 : i32
    %c0_i32_0 = arith.constant 0 : i32
    return %arg0, %c0_i32, %arg1 : i32, i32, i32
  }
  func.func @transform_6(%arg0: i32, %arg1: i32) -> (i32, i32, i32, i32) {
    %c0_i32 = arith.constant 0 : i32
    %c0_i32_0 = arith.constant 0 : i32
    %c0_i32_1 = arith.constant 0 : i32
    return %arg0, %arg1, %c0_i32, %c0_i32_0 : i32, i32, i32, i32
  }
  func.func @transform_7(%arg0: i32, %arg1: i32) -> (i32, i32, i32, i32) {
    %c0_i32 = arith.constant 0 : i32
    %c0_i32_0 = arith.constant 0 : i32
    %c0_i32_1 = arith.constant 0 : i32
    return %arg0, %arg1, %c0_i32, %c0_i32_0 : i32, i32, i32, i32
  }
}

module attributes {stable_mosaic.version = 11 : i64} {
  func.func @_bn_leaky_kernel(%arg0: i32, %arg1: i32, %arg2: memref<1x8x128xbf16, #tpu.memory_space<vmem>>, %arg3: memref<8x1xf32, #tpu.memory_space<vmem>>, %arg4: memref<8x1xf32, #tpu.memory_space<vmem>>, %arg5: memref<1x8x128xf32, #tpu.memory_space<vmem>>) attributes {dimension_semantics = [#tpu.dimension_semantics<parallel>, #tpu.dimension_semantics<parallel>], iteration_bounds = array<i64: 2, 1>, scalar_prefetch = 0 : i64, scratch_operands = 0 : i64, tpu.core_type = #tpu.core_type<tc>, window_params = [{transform_indices = @transform_0, window_bounds = array<i64: 1, 8, 128>}, {pipeline_mode = #tpu.pipeline_mode<synchronous>, transform_indices = @transform_1, window_bounds = array<i64: 8, 1>}, {pipeline_mode = #tpu.pipeline_mode<synchronous>, transform_indices = @transform_2, window_bounds = array<i64: 8, 1>}, {transform_indices = @transform_3, window_bounds = array<i64: 1, 8, 128>}]} {
    %c0 = arith.constant 0 : index
    %c0_0 = arith.constant 0 : index
    %c0_1 = arith.constant 0 : index
    %0 = vector.load %arg2[%c0, %c0_0, %c0_1] : memref<1x8x128xbf16, #tpu.memory_space<vmem>>, vector<1x8x128xbf16>
    %1 = vector.shape_cast %0 : vector<1x8x128xbf16> to vector<8x128xbf16>
    %2 = arith.extf %1 : vector<8x128xbf16> to vector<8x128xf32>
    %c0_2 = arith.constant 0 : index
    %c0_3 = arith.constant 0 : index
    %3 = vector.load %arg3[%c0_2, %c0_3] : memref<8x1xf32, #tpu.memory_space<vmem>>, vector<8x1xf32>
    %4 = vector.broadcast %3 : vector<8x1xf32> to vector<8x128xf32>
    %5 = arith.mulf %2, %4 : vector<8x128xf32>
    %c0_4 = arith.constant 0 : index
    %c0_5 = arith.constant 0 : index
    %6 = vector.load %arg4[%c0_4, %c0_5] : memref<8x1xf32, #tpu.memory_space<vmem>>, vector<8x1xf32>
    %7 = vector.broadcast %6 : vector<8x1xf32> to vector<8x128xf32>
    %8 = arith.addf %5, %7 : vector<8x128xf32>
    %cst = arith.constant 0.000000e+00 : f32
    %9 = vector.broadcast %cst : f32 to vector<8x128xf32>
    %10 = arith.cmpf ogt, %8, %9 : vector<8x128xf32>
    %cst_6 = arith.constant 2.000000e-01 : f32
    %11 = vector.broadcast %cst_6 : f32 to vector<8x128xf32>
    %12 = arith.mulf %11, %8 : vector<8x128xf32>
    %13 = arith.select %10, %8, %12 : vector<8x128xi1>, vector<8x128xf32>
    %c0_7 = arith.constant 0 : index
    %c0_8 = arith.constant 0 : index
    %c0_9 = arith.constant 0 : index
    %14 = vector.load %arg5[%c0_7, %c0_8, %c0_9] : memref<1x8x128xf32, #tpu.memory_space<vmem>>, vector<1x8x128xf32>
    %15 = vector.shape_cast %14 : vector<1x8x128xf32> to vector<8x128xf32>
    %16 = vector.shape_cast %13 : vector<8x128xf32> to vector<1x8x128xf32>
    tpu.vector_store %arg5[%c0_7, %c0_8, %c0_9], %16 {strides = array<i32>} : memref<1x8x128xf32, #tpu.memory_space<vmem>>, vector<1x8x128xf32>,
    return
  }
  func.func @transform_0(%arg0: i32, %arg1: i32) -> (i32, i32, i32) {
    %c0_i32 = arith.constant 0 : i32
    %c0_i32_0 = arith.constant 0 : i32
    return %arg0, %c0_i32, %arg1 : i32, i32, i32
  }
  func.func @transform_1(%arg0: i32, %arg1: i32) -> (i32, i32) {
    %c0_i32 = arith.constant 0 : i32
    %c0_i32_0 = arith.constant 0 : i32
    %c0_i32_1 = arith.constant 0 : i32
    return %c0_i32, %c0_i32_0 : i32, i32
  }
  func.func @transform_2(%arg0: i32, %arg1: i32) -> (i32, i32) {
    %c0_i32 = arith.constant 0 : i32
    %c0_i32_0 = arith.constant 0 : i32
    %c0_i32_1 = arith.constant 0 : i32
    return %c0_i32, %c0_i32_0 : i32, i32
  }
  func.func @transform_3(%arg0: i32, %arg1: i32) -> (i32, i32, i32) {
    %c0_i32 = arith.constant 0 : i32
    %c0_i32_0 = arith.constant 0 : i32
    return %arg0, %c0_i32, %arg1 : i32, i32, i32
  }
}

</mosaic_0001>

<bundles_post_ra>
// kernel: mul.21
= control target key start
LH: loop header
LB: loop body
LE: loop exit
PB: predicated region body
PF: predicated region fallthrough
CT: control target
= control target key end

     0   :  { %s34_s0 = inlined_call_operand.vmem [shape: f32[8,1], index: 0, kind: input, shape index: {}]   ;;  %s35_s1 = inlined_call_operand.vmem [shape: f32[8,1], index: 1, kind: input, shape index: {}]   ;;  %s36_s2 = inlined_call_operand.vmem [shape: f32[8,1], index: 2, kind: output, shape index: {}]  }
   0x1   :  { %v3_v0 = vld [vmem:[%s34_s0] sm:$0xff] }
   0x2   :  { %v4_v1 = vld [vmem:[%s35_s1] sm:$0xff] }
   0x3   :  { %v7_v2 = vmul.f32 %v4_v1, %v3_v0 }
   0x5   :  { %9 = vst [vmem:[%s36_s2] sm:$0xff] %v7_v2 }

// kernel: adaptive_pconv_define.3
= control target key start
LH: loop header
LB: loop body
LE: loop exit
PB: predicated region body
PF: predicated region fallthrough
CT: control target
= control target key end

     0   :  { %s371_s12 = smov 0   ;;  %s373_s13 = smov 0   ;;  %s407_s0 = inlined_call_operand.vmem [shape: bf16[2,8,128], index: 0, kind: input, shape index: {}]   ;;  %s408_s1 = inlined_call_operand.vmem [shape: f32[8,1], index: 1, kind: input, shape index: {}]   ;;  %s409_s2 = inlined_call_operand.vmem [shape: f32[8,1], index: 2, kind: input, shape index: {}]   ;;  %s410_s3 = inlined_call_operand.vmem [shape: f32[2,8,128], index: 3, kind: output, shape index: {}]  }
   0x1   :  { %s375_s14 = smov 0  }
   0x2 LB: > { %s25_s15 = sadd.s32 1, %s344_s13  ;;  %p295_p0 = scmp.ge.s32.totalorder %s348_s14, 1  ;;  %s348_s14 = sphi %s375_s14, %s13_s14   ;;  %s344_s13 = sphi %s373_s13, %s412_s13   ;;  %s340_s12 = sphi %s371_s12, %s411_s12  }
   0x3   : > { %p27_p1 = scmp.ge.s32.totalorder %s25_s15, 2  ;;  %p155_p2 = scmp.lt.s32.totalorder %s348_s14, 3 }
   0x5   : > { %s414_s15 = smov (%p27_p1, %s25_s15), 0  ;;  %p156_p3 = pnand %p295_p0, %p155_p2 }
   0x6   : > { %v199_v0 = vld [vmem:[%s408_s1] sm:$0xff] (!%p156_p3)  ;;  %v350_v1 = vmov (!%p156_p3), 0   ;;  %p183_p4 = scmp.lt.s32.totalorder (!%p156_p3), %s340_s12, 1 }
   0x7   : > { %159 = sbr.rel (%p156_p3) target bundleno = 146 (0x92), region = 32  ;;  %325 = vset.pattern.permute.xlu0 (!%p156_p3), %v350_v1  ;;  %v206_v2 = vld [vmem:[%s409_s2] sm:$0xff] (!%p156_p3) }
   0x8   : > { %202 = vperm.xlu0 (!%p156_p3), %325, %v199_v0  }
   0xc   : > { %209 = vperm.xlu0 (!%p156_p3), %325, %v206_v2  }
   0xe   : > { %s416_s12 = smov (!%p183_p4, %s340_s12), 1 }
   0xf   : > { %s296_s20 = sshll.u32 %s416_s12, 2  ;;  %s297_s24 = sshll.u32 %s416_s12, 3 }
  0x10   : > { %s189_s23 = scalar_lea.vmem %s407_s0, %s296_s20  ;;  %s196_s27 = scalar_lea.vmem %s410_s3, %s297_s24 }
  0x11   : > { %v197_v3 = vld [vmem:[%s189_s23] sm:$0xf] }
  0x12   : > { %v198_v4 = vunpack.c.l.bf16 %v197_v3 }
  0x87   : > { %v203_v5 = vpop.permute.xlu0 %202 }
  0x88   : > { %v205_v6 = vmul.f32 %v203_v5, %v198_v4 }
  0x8b   : > { %v210_v7 = vpop.permute.xlu0 %209 }
  0x8c   : > { %v212_v8 = vadd.f32 %v210_v7, %v205_v6 }
  0x8e   : > { %vm213_vm0 = vcmp.gt.f32.partialorder %v212_v8, 0.0  ;;  %v214_v9 = vmul.f32 0.2, %v212_v8 }
  0x90   : > { %v215_v10 = vsel %vm213_vm0, %v212_v8, %v214_v9 }
  0x91   : > { %216 = vst [vmem:[%s196_s27] sm:$0xff] %v215_v10 }
  0x92 PF: > { %s13_s14 = sadd.s32 1, %s348_s14   ;;  %s411_s12 = smov %s344_s13 }
  0x93   : > { %p10_p5 = scmp.ge.s32.totalorder %s13_s14, 4   ;;  %s412_s13 = smov %s414_s15 }
  0x95   :  { %12 = sbr.rel (!%p10_p5) target bundleno = 2 (0x2), region = 62 }

// kernel: adaptive_pconv_define.2
= control target key start
LH: loop header
LB: loop body
LE: loop exit
PB: predicated region body
PF: predicated region fallthrough
CT: control target
= control target key end

     0   :  { %s931_s24 = smov 0   ;;  %s933_s25 = smov 0   ;;  %s988_s0 = inlined_call_operand.vmem [shape: bf16[2,64,128], index: 0, kind: input, shape index: {}]   ;;  %s989_s1 = inlined_call_operand.vmem [shape: bf16[2,48,128], index: 1, kind: input, shape index: {}]   ;;  %s990_s2 = inlined_call_operand.vmem [shape: bf16[8,64], index: 2, kind: input, shape index: {}]   ;;  %s991_s3 = inlined_call_operand.vmem [shape: bf16[8,48], index: 3, kind: input, shape index: {}]   ;;  %s992_s4 = inlined_call_operand.vmem [shape: bf16[2,8,128], index: 4, kind: output, shape index: {0}]   ;;  %s993_s5 = inlined_call_operand.vmem [shape: bf16[2,8,128], index: 5, kind: output, shape index: {1}]   ;;  %s994_s6 = inlined_call_operand.vmem [shape: f32[2,1,8,1], index: 6, kind: output, shape index: {2}]   ;;  %s995_s7 = inlined_call_operand.vmem [shape: f32[2,1,8,1], index: 7, kind: output, shape index: {3}]  }
   0x1   :  { %s935_s26 = smov 0  }
   0x2 LB: > { %s30_s27 = sadd.s32 1, %s883_s25  ;;  %p778_p0 = scmp.ge.s32.totalorder %s887_s26, 1  ;;  %s887_s26 = sphi %s935_s26, %s18_s26   ;;  %s883_s25 = sphi %s933_s25, %s997_s25   ;;  %s879_s24 = sphi %s931_s24, %s996_s24  }
   0x3   : > { %p32_p1 = scmp.ge.s32.totalorder %s30_s27, 2  ;;  %p284_p2 = scmp.lt.s32.totalorder %s887_s26, 3 }
   0x5   : > { %s999_s27 = smov (%p32_p1, %s30_s27), 0  ;;  %p285_p3 = pnand %p778_p0, %p284_p2 }
   0x6   : > { %p350_p4 = scmp.lt.s32.totalorder (!%p285_p3), %s879_s24, 1  ;;  %v889_v0 = vmov (!%p285_p3), 0.0   ;;  %vm890_vm0 = vmmov (!%p285_p3), 0   ;;  %v472_v8 = vld [vmem:[%s991_s3] sm:$0xf] (!%p285_p3)  ;;  %vm497_vm1 = vcmask (!%p285_p3), 392192  }
   0x7   : > { %288 = sbr.rel (%p285_p3) target bundleno = 404 (0x194), region = 36  ;;  %819 = vmatprep.subr.bf16.mxu1 (!%p285_p3), %v889_v0  ;;  %807 = vmatprep.subr.bf16.mxu0 (!%p285_p3), %v889_v0  ;;  %v395_v9 = vld [vmem:[%s990_s2] sm:$0xf] (!%p285_p3)  ;;  %vm428_vm2 = vcmask (!%p285_p3), 523264   ;;  %vm550_vm3 = vcmask (!%p285_p3), 7168  }
   0x8   : > { %825 = vmatprep.mubr.msk.bf16.mxu1 (!%p285_p3), %vm890_vm0, %v889_v0  ;;  %815 = vmatprep.mubr.msk.bf16.mxu0 (!%p285_p3), %vm890_vm0, %v889_v0 }
   0xe   : > { %s1001_s24 = smov (!%p350_p4, %s879_s24), 1 }
   0xf   : > { %s829_s28 = smul.u32 24, %s1001_s24  ;;  %s797_s29 = sshll.u32 %s1001_s24, 5 }
  0x10   : > { %s357_s9 = scalar_lea.vmem %s988_s0, %s797_s29  ;;  %s782_s17 = sshll.u32 %s1001_s24, 2 }
  0x11   : > { %s365_s12 = scalar_lea.vmem %s989_s1, %s829_s28  ;;  %v858_v1 = vld [vmem:[%s357_s9] sm:$0xff]   ;;  %v860_v4 = vld [vmem:[%s357_s9 + $0x8] sm:$0xff]   ;;  %v861_v5 = vld [vmem:[%s357_s9 + $0x10] sm:$0xff]   ;;  %s379_s20 = scalar_lea.vmem %s993_s5, %s782_s17 }
  0x12   : > { %v856_v2 = vld [vmem:[%s365_s12] sm:$0xff]   ;;  %808 = vmatpush3.bf16.msra.mxu0 %v858_v1  ;;  %v857_v3 = vld [vmem:[%s365_s12 + $0x8] sm:$0xff]   ;;  %v859_v6 = vld [vmem:[%s365_s12 + $0x10] sm:$0xff]   ;;  %s372_s23 = scalar_lea.vmem %s992_s4, %s782_s17  ;;  %s784_s28 = sshll.u32 %s1001_s24, 3 }
  0x13   : > { %820 = vmatpush3.bf16.msra.mxu1 %v856_v2  ;;  %809 = vmatprep.subr.bf16.mxu0 %v889_v0  ;;  %v862_v7 = vld [vmem:[%s357_s9 + $0x18] sm:$0xff]   ;;  %s386_s8 = scalar_lea.vmem %s994_s6, %s784_s28  ;;  %s393_s11 = scalar_lea.vmem %s995_s7, %s784_s28 }
  0x14   : > { %821 = vmatprep.subr.bf16.mxu1 %v889_v0 }
  0x16   : > { %810 = vmatpush3.bf16.msra.mxu0 %v860_v4 }
  0x17   : > { %822 = vmatpush3.bf16.msra.mxu1 %v857_v3  ;;  %811 = vmatprep.subr.bf16.mxu0 %v889_v0 }
  0x18   : > { %823 = vmatprep.subr.bf16.mxu1 %v889_v0 }
  0x1a   : > { %812 = vmatpush3.bf16.msra.mxu0 %v861_v5 }
  0x1b   : > { %824 = vmatpush3.bf16.msra.mxu1 %v859_v6  ;;  %813 = vmatprep.subr.bf16.mxu0 %v889_v0 }
  0x1e   : > { %826 = vmatmul.mubr.msk.bf16.vlgmr.msra.gmra.mrb[0].mxu1 %vm497_vm1, %v472_v8  ;;  %814 = vmatpush3.bf16.msra.mxu0 %v862_v7 }
  0x21   : > { %816 = vmatmul.mubr.msk.bf16.vlgmr.msra.gmra.mrb[0].mxu0 %vm428_vm2, %v395_v9 }
  0xf1   : > { %v535_v10 = vpop.f32.mrb[0].mxu1 }
  0xf2   : > { %863 = vtanh.f32 %v535_v10  ;;  %v827_v11 = vpop.f32.mrb[1].mxu1 }
  0xf3   : > { %v538_v12 = vpop.f32.mrb[2].mxu1 }
  0xf4   : > { %v828_v13 = vpop.f32.mrb[3].mxu1  ;;  %v466_v14 = vpop.f32.mrb[0].mxu0 }
  0xf5   : > { %v817_v15 = vpop.f32.mrb[1].mxu0 }
  0xf6   : > { %v469_v16 = vpop.f32.mrb[2].mxu0 }
  0xf7   : > { %v818_v17 = vpop.f32.mrb[3].mxu0 }
  0xfc   : > { %v864_v18 = vpop.eup %863 }
  0xfd   : > { %v542_v19 = vand.u32 2147483647, %v864_v18 }
  0xff   : > { %v543_v20 = vmul.f32 %v542_v19, %v466_v14  ;;  %v546_v21 = vpack.c.bf16 %v542_v19, %v542_v19 }
 0x101   : > { %v544_v22 = vpack.c.bf16 %v543_v20, %v543_v20  ;;  %547 = vst [vmem:[%s379_s20] sm:$0xf] %v546_v21  ;;  %548 = vadd.xlane.f32.xlu0 %v543_v20  ;;  %v552_v23 = vmul.f32 %v543_v20, %v543_v20 }
 0x103   : > { %545 = vst [vmem:[%s372_s23] sm:$0xf] %v544_v22 }
 0x105   : > { %553 = vadd.xlane.f32.xlu0 %v552_v23 }
 0x18e   : > { %v549_v24 = vpop.xlane.xlu0 %548 }
 0x18f   : > { %551 = vst.msk [vmem:[%s386_s8] sm:$0xff] %vm550_vm3, %v549_v24 }
 0x192   : > { %v554_v25 = vpop.xlane.xlu0 %553 }
 0x193   : > { %555 = vst.msk [vmem:[%s393_s11] sm:$0xff] %vm550_vm3, %v554_v25 }
 0x194 PF: > { %s18_s26 = sadd.s32 1, %s887_s26   ;;  %s996_s24 = smov %s883_s25 }
 0x195   : > { %p15_p5 = scmp.ge.s32.totalorder %s18_s26, 4   ;;  %s997_s25 = smov %s999_s27 }
 0x197   :  { %17 = sbr.rel (!%p15_p5) target bundleno = 2 (0x2), region = 105 }

</bundles_post_ra>
